<compile_context>
chip_gen: v5e
topology: v5e:2x2
jax: 0.10.0
libtpu: 0.0.40
codegen_flags: <defaults>
</compile_context>

<pallas_src>
import math
from typing import NamedTuple

import jax
import jax.numpy as jnp
from jax import lax
from jax.experimental import pallas as pl
from jax.experimental.pallas import tpu as pltpu

_LANE = 128
_SQRT_HALF = 1.0 / math.sqrt(2.0)


def _round_up(x, m):
    return ((x + m - 1) // m) * m


def _vmem_capacity_bytes():
    """Physical VMEM of the local chip; conservative 64 MiB (v7x) fallback."""
    try:
        info = pltpu.get_tpu_info()
        cap = getattr(info, "vmem_capacity_bytes", None)
        if cap:
            return int(cap)
    except Exception:
        pass
    return 64 << 20


# ----------------------------------------------------------------------------
# Kernels
# ----------------------------------------------------------------------------
def _mlp_kernel_resident(x_ref, w1_ref, b1_ref, w2_ref, b2_ref, o_ref):
    """Whole mlp_dim per step: fc1 -> GELU -> fc2, weights VMEM-resident."""
    # Cast x to the MXU compute dtype in-kernel (no wrapper-side cast pass).
    x = x_ref[...].astype(w1_ref.dtype)
    h = jnp.dot(x, w1_ref[...], preferred_element_type=jnp.float32)
    h = h + b1_ref[...]                                   # bias in f32
    # Exact (erf) GELU — matches torch.nn.functional.gelu default (EUP slot).
    h = 0.5 * h * (1.0 + lax.erf(h * _SQRT_HALF))
    # dropout: identity in eval mode.
    y = jnp.dot(h.astype(w2_ref.dtype), w2_ref[...],
                preferred_element_type=jnp.float32)
    o_ref[...] = (y + b2_ref[...]).astype(o_ref.dtype)


def _mlp_kernel_ktiled(x_ref, w1_ref, b1_ref, w2_ref, b2_ref, o_ref, acc_ref):
    """mlp_dim chunked over grid axis 1; f32 accumulator over fc2 partials."""
    k = pl.program_id(1)

    @pl.when(k == 0)
    def _init():
        acc_ref[...] = jnp.zeros_like(acc_ref)

    x = x_ref[...].astype(w1_ref.dtype)
    h = jnp.dot(x, w1_ref[...], preferred_element_type=jnp.float32)
    h = h + b1_ref[...]
    h = 0.5 * h * (1.0 + lax.erf(h * _SQRT_HALF))
    acc_ref[...] += jnp.dot(h.astype(w2_ref.dtype), w2_ref[...],
                            preferred_element_type=jnp.float32)

    @pl.when(k == pl.num_programs(1) - 1)
    def _finish():
        o_ref[...] = (acc_ref[...] + b2_ref[...]).astype(o_ref.dtype)


# ----------------------------------------------------------------------------
# Parameter preparation (pad + cast ONCE, choose mlp chunking)
# ----------------------------------------------------------------------------
class MlpParams(NamedTuple):
    w1: jax.Array       # (hidden_p, mlp_p) compute dtype
    b1: jax.Array       # (1, mlp_p) f32
    w2: jax.Array       # (mlp_p, hidden_p) compute dtype
    b2: jax.Array       # (1, hidden_p) f32
    hidden: int
    hidden_p: int
    mlp_dim: int
    mlp_p: int
    tk: int             # mlp chunk size per grid step
    n_k: int             # number of mlp chunks (1 => weights fully resident)


def prepare_params(w1, b1, w2, b2, *, compute_dtype=jnp.bfloat16,
                   block_mlp=None):
    """Pad lane dims to 128 multiples, cast weights once, pick mlp chunking."""
    hidden, mlp_dim = w1.shape
    cd = jnp.dtype(compute_dtype)

    hidden_p = _round_up(hidden, _LANE)
    mlp_p0 = _round_up(mlp_dim, _LANE)

    capacity = _vmem_capacity_bytes()
    budget = int(capacity * 0.78)        # leave compiler-scratch headroom
    weight_budget = budget // 2          # keep >= half of VMEM for activations

    # Resident footprint assumes single-buffered weights (pl.Buffered(1)).
    resident_bytes = 2 * hidden_p * mlp_p0 * cd.itemsize + (mlp_p0 + hidden_p) * 4

    if block_mlp is not None:
        tk = min(_round_up(block_mlp, _LANE), mlp_p0)
    elif resident_bytes <= weight_budget:
        tk = mlp_p0                                        # fully resident
    else:
        # Stream (hidden_p, tk)/(tk, hidden_p) slices, double-buffered.
        n_k_guess = max(2, -(-resident_bytes // weight_budget))
        mult = 256 if mlp_p0 >= 256 else _LANE             # 256x256 MXU friendly
        tk = min(_round_up(-(-mlp_p0 // n_k_guess), mult), mlp_p0)

    n_k = -(-mlp_p0 // tk)
    mlp_p = n_k * tk   # pad mlp to a chunk multiple (zeros -> gelu(0)=0, exact)

    w1_p = w1
    if (hidden_p, mlp_p) != w1.shape:
        w1_p = jnp.pad(w1, ((0, hidden_p - hidden), (0, mlp_p - mlp_dim)))
    w2_p = w2
    if (mlp_p, hidden_p) != w2.shape:
        w2_p = jnp.pad(w2, ((0, mlp_p - mlp_dim), (0, hidden_p - hidden)))
    w1_p = w1_p.astype(cd)
    w2_p = w2_p.astype(cd)
    b1_p = jnp.pad(b1.astype(jnp.float32), (0, mlp_p - mlp_dim)).reshape(1, mlp_p)
    b2_p = jnp.pad(b2.astype(jnp.float32), (0, hidden_p - hidden)).reshape(1, hidden_p)

    return MlpParams(w1_p, b1_p, w2_p, b2_p, hidden, hidden_p,
                     mlp_dim, mlp_p, tk, n_k)


# ----------------------------------------------------------------------------
# Forward
# ----------------------------------------------------------------------------
def mlp_forward(x, params: MlpParams, *, block_tokens=None, out_dtype=None):
    """x: (..., hidden). Returns same shape, dtype = out_dtype or x.dtype."""
    orig_shape = x.shape
    hidden = params.hidden
    assert orig_shape[-1] == hidden, (orig_shape, hidden)
    out_dtype = jnp.dtype(out_dtype) if out_dtype is not None else jnp.dtype(x.dtype)

    hidden_p, mlp_p, tk, n_k = params.hidden_p, params.mlp_p, params.tk, params.n_k
    cd = params.w1.dtype
    resident = n_k == 1

    x2d = x.reshape(-1, hidden)
    tokens = x2d.shape[0]

    # Skip pad entirely in the aligned (common) case; in-kernel cast handles
    # the compute dtype. When padding is unavoidable, fold the cast into it.
    if hidden_p == hidden:
        x_in = x2d
    else:
        x_in = jnp.pad(x2d.astype(cd), ((0, 0), (0, hidden_p - hidden)))

    # ---- VMEM accounting (matches what the pipeline actually allocates). ----
    capacity = _vmem_capacity_bytes()
    budget = int(capacity * 0.78)
    cd_size = cd.itemsize
    x_size = x_in.dtype.itemsize
    o_size = out_dtype.itemsize

    wbuf = 1 if resident else 2          # single-buffered only when resident
    weight_bytes = (wbuf * (hidden_p * tk + tk * hidden_p) * cd_size
                    + wbuf * tk * 4 + hidden_p * 4)

    per_tok = hidden_p * (2 * x_size + 2 * o_size) + 2 * tk * 4  # x/out 2-buf + f32 h
    if not resident:
        per_tok += hidden_p * 4          # f32 accumulator scratch

    remaining = max(budget - weight_bytes, per_tok * 16)
    tm_vmem = max(16, (remaining // per_tok) // 16 * 16)

    if block_tokens is None:
        block_tokens = 1024 if capacity >= (96 << 20) else 512   # v5e/v6e vs v7x

    # >= ~4 token tiles when tokens allow: feeds both v7x TCs + overlaps DMA.
    tm = min(block_tokens, tm_vmem, max(16, _round_up(pl.cdiv(tokens, 4), 16)))
    tm = min(tm, tokens)
    grid_tokens = pl.cdiv(tokens, tm)

    est_vmem = weight_bytes + tm * per_tok + (2 << 20)
    vmem_limit = min(int(capacity * 0.87), max(32 << 20, int(est_vmem * 1.25)))

    cost = pl.CostEstimate(
        flops=4 * tokens * hidden_p * mlp_p,
        transcendentals=tokens * mlp_p,
        bytes_accessed=(x_in.size * x_size
                        + params.w1.size * cd_size + params.w2.size * cd_size
                        + (params.b1.size + params.b2.size) * 4
                        + tokens * hidden_p * o_size),
    )

    def _build(single_buffer):
        mode = pl.Buffered(1) if (single_buffer and hasattr(pl, "Buffered")) else None

        def const_spec(shape, index_map):
            if mode is not None:
                return pl.BlockSpec(shape, index_map, pipeline_mode=mode)
            return pl.BlockSpec(shape, index_map)

        if resident:
            grid = (grid_tokens,)
            in_specs = [
                pl.BlockSpec((tm, hidden_p), lambda i: (i, 0)),          # x tile
                const_spec((hidden_p, tk), lambda i: (0, 0)),            # w1
                const_spec((1, tk), lambda i: (0, 0)),                   # b1
                const_spec((tk, hidden_p), lambda i: (0, 0)),            # w2
                const_spec((1, hidden_p), lambda i: (0, 0)),             # b2
            ]
            out_specs = pl.BlockSpec((tm, hidden_p), lambda i: (i, 0))
            kernel = _mlp_kernel_resident
            scratch = []
            dims = ("parallel",)
        else:
            grid = (grid_tokens, n_k)
            in_specs = [
                pl.BlockSpec((tm, hidden_p), lambda i, k: (i, 0)),       # x tile
                pl.BlockSpec((hidden_p, tk), lambda i, k: (0, k)),       # w1 slice
                pl.BlockSpec((1, tk), lambda i, k: (0, k)),              # b1 slice
                pl.BlockSpec((tk, hidden_p), lambda i, k: (k, 0)),       # w2 slice
                const_spec((1, hidden_p), lambda i, k: (0, 0)),          # b2
            ]
            out_specs = pl.BlockSpec((tm, hidden_p), lambda i, k: (i, 0))
            kernel = _mlp_kernel_ktiled
            scratch = [pltpu.VMEM((tm, hidden_p), jnp.float32)]
            dims = ("parallel", "arbitrary")

        return pl.pallas_call(
            kernel,
            out_shape=jax.ShapeDtypeStruct((tokens, hidden_p), out_dtype),
            grid=grid,
            in_specs=in_specs,
            out_specs=out_specs,
            scratch_shapes=scratch,
            compiler_params=pltpu.CompilerParams(
                dimension_semantics=dims,
                vmem_limit_bytes=vmem_limit,
            ),
            cost_estimate=cost,
        )

    args = (x_in, params.w1, params.b1, params.w2, params.b2)
    try:
        out = _build(True)(*args)
    except Exception:
        # Fallback if single-buffered (pl.Buffered(1)) resident weights are
        # not supported by this JAX build: use default double-buffering.
        out = _build(False)(*args)

    if hidden_p != hidden:
        out = out[:, :hidden]            # only pay the slice for odd widths
    return out.reshape(orig_shape)


# ----------------------------------------------------------------------------
# Init + reference
# ----------------------------------------------------------------------------
def init_params(key, hidden_size, mlp_dim, dtype=jnp.float32):
    """Xavier-uniform weights, normal(std=1e-6) biases, as in Mlp._init_weights."""
    k1, k2, k3, k4 = jax.random.split(key, 4)
    limit1 = math.sqrt(6.0 / (hidden_size + mlp_dim))
    limit2 = math.sqrt(6.0 / (mlp_dim + hidden_size))
    # Stored as (in, out): kernel computes x @ W, equivalent to PyTorch's
    # x @ weight.T with weight of shape (out, in).
    w1 = jax.random.uniform(k1, (hidden_size, mlp_dim), dtype, -limit1, limit1)
    w2 = jax.random.uniform(k2, (mlp_dim, hidden_size), dtype, -limit2, limit2)
    b1 = (1e-6 * jax.random.normal(k3, (mlp_dim,), dtype)).astype(dtype)
    b2 = (1e-6 * jax.random.normal(k4, (hidden_size,), dtype)).astype(dtype)
    return w1, b1, w2, b2


def _reference(x, w1, b1, w2, b2):
    h = x @ w1 + b1
    h = 0.5 * h * (1.0 + lax.erf(h * _SQRT_HALF))
    return h @ w2 + b2


# TODO(synk): training-mode dropout (pltpu.prng_seed / stateful_bernoulli) not
# implemented; eval-mode identity is assumed, matching model.eval().

if __name__ == "__main__":
    # Small config consistent with the module: hidden_size=32, mlp_dim=64.
    batch, seq, hidden_size, mlp_dim = 2, 8, 32, 64

    key = jax.random.PRNGKey(0)
    kx, kp = jax.random.split(key)
    x = jax.random.normal(kx, (batch, seq, hidden_size), jnp.float32)
    w1, b1, w2, b2 = init_params(kp, hidden_size, mlp_dim)
    y_ref = _reference(x, w1, b1, w2, b2)

    # 1) Default bf16 MXU path (resident weights) — production path.
    params_bf16 = prepare_params(w1, b1, w2, b2)
    y = mlp_forward(x, params_bf16)
    jax.block_until_ready(y)
    assert y.shape == (batch, seq, hidden_size)
    assert jnp.allclose(y, y_ref, atol=5e-2, rtol=5e-2), float(
        jnp.max(jnp.abs(y - y_ref)))

    # 2) f32 compute path — tight structural check (padding, tiling, GELU).
    params_f32 = prepare_params(w1, b1, w2, b2, compute_dtype=jnp.float32)
    y32 = mlp_forward(x, params_f32)
    jax.block_until_ready(y32)
    assert jnp.allclose(y32, y_ref, atol=1e-4, rtol=1e-4), float(
        jnp.max(jnp.abs(y32 - y_ref)))

    # 3) Multi token-tile path with a partial last block (tokens=28, TM=16).
    x2 = jax.random.normal(jax.random.PRNGKey(1), (4, 7, hidden_size), jnp.float32)
    y2 = mlp_forward(x2, params_f32, block_tokens=16)
    jax.block_until_ready(y2)
    y2_ref = _reference(x2, w1, b1, w2, b2)
    assert y2.shape == x2.shape
    assert jnp.allclose(y2, y2_ref, atol=1e-4, rtol=1e-4), float(
        jnp.max(jnp.abs(y2 - y2_ref)))

    # 4) mlp_dim-tiled reduction-axis path (streamed weights + f32 accumulator).
    mlp_dim2 = 256
    w1b, b1b, w2b, b2b = init_params(jax.random.PRNGKey(2), hidden_size, mlp_dim2)
    params_k = prepare_params(w1b, b1b, w2b, b2b, compute_dtype=jnp.float32,
                              block_mlp=128)
    assert params_k.n_k == 2
    y3 = mlp_forward(x, params_k)
    jax.block_until_ready(y3)
    y3_ref = _reference(x, w1b, b1b, w2b, b2b)
    assert jnp.allclose(y3, y3_ref, atol=1e-4, rtol=1e-4), float(
        jnp.max(jnp.abs(y3 - y3_ref)))

    # 5) Lane-aligned hidden: no activation pad, no post-kernel slice.
    hidden3, mlp3 = 128, 512
    x4 = jax.random.normal(jax.random.PRNGKey(3), (2, 8, hidden3), jnp.float32)
    w1c, b1c, w2c, b2c = init_params(jax.random.PRNGKey(4), hidden3, mlp3)
    params_c = prepare_params(w1c, b1c, w2c, b2c, compute_dtype=jnp.float32)
    y4 = mlp_forward(x4, params_c)
    jax.block_until_ready(y4)
    y4_ref = _reference(x4, w1c, b1c, w2c, b2c)
    assert jnp.allclose(y4, y4_ref, atol=1e-4, rtol=1e-4), float(
        jnp.max(jnp.abs(y4 - y4_ref)))

    print("KERNEL_OK")
</pallas_src>

<mosaic_0001>
module attributes {stable_mosaic.version = 11 : i64} {
  func.func @_mlp_kernel_resident(%arg0: i32, %arg1: memref<16x128xbf16, #tpu.memory_space<vmem>>, %arg2: memref<128x128xbf16, #tpu.memory_space<vmem>>, %arg3: memref<1x128xf32, #tpu.memory_space<vmem>>, %arg4: memref<128x128xbf16, #tpu.memory_space<vmem>>, %arg5: memref<1x128xf32, #tpu.memory_space<vmem>>, %arg6: memref<16x128xf32, #tpu.memory_space<vmem>>) attributes {dimension_semantics = [#tpu.dimension_semantics<parallel>], iteration_bounds = array<i64: 1>, scalar_prefetch = 0 : i64, scratch_operands = 0 : i64, tpu.core_type = #tpu.core_type<tc>, window_params = [{transform_indices = @transform_0, window_bounds = array<i64: 16, 128>}, {pipeline_mode = #tpu.pipeline_mode<synchronous>, transform_indices = @transform_1, window_bounds = array<i64: 128, 128>}, {pipeline_mode = #tpu.pipeline_mode<synchronous>, transform_indices = @transform_2, window_bounds = array<i64: 1, 128>}, {pipeline_mode = #tpu.pipeline_mode<synchronous>, transform_indices = @transform_3, window_bounds = array<i64: 128, 128>}, {pipeline_mode = #tpu.pipeline_mode<synchronous>, transform_indices = @transform_4, window_bounds = array<i64: 1, 128>}, {transform_indices = @transform_5, window_bounds = array<i64: 16, 128>}]} {
    %c0 = arith.constant 0 : index
    %c0_0 = arith.constant 0 : index
    %0 = vector.load %arg1[%c0, %c0_0] : memref<16x128xbf16, #tpu.memory_space<vmem>>, vector<16x128xbf16>
    %c0_1 = arith.constant 0 : index
    %c0_2 = arith.constant 0 : index
    %1 = vector.load %arg2[%c0_1, %c0_2] : memref<128x128xbf16, #tpu.memory_space<vmem>>, vector<128x128xbf16>
    %cst = arith.constant dense<0.000000e+00> : vector<16x128xf32>
    %2 = tpu.matmul %0, %1, %cst {dimension_numbers = #tpu.dot_dimension_numbers<[1], [0], [0], [1], [0, 0, 1, 1], [], []>} : vector<16x128xbf16>, vector<128x128xbf16>, vector<16x128xf32> -> vector<16x128xf32>
    %c0_3 = arith.constant 0 : index
    %c0_4 = arith.constant 0 : index
    %3 = vector.load %arg3[%c0_3, %c0_4] : memref<1x128xf32, #tpu.memory_space<vmem>>, vector<1x128xf32>
    %4 = vector.broadcast %3 : vector<1x128xf32> to vector<16x128xf32>
    %5 = arith.addf %2, %4 : vector<16x128xf32>
    %cst_5 = arith.constant 5.000000e-01 : f32
    %6 = vector.broadcast %cst_5 : f32 to vector<16x128xf32>
    %7 = arith.mulf %6, %5 : vector<16x128xf32>
    %cst_6 = arith.constant 0.707106769 : f32
    %8 = vector.broadcast %cst_6 : f32 to vector<16x128xf32>
    %9 = arith.mulf %5, %8 : vector<16x128xf32>
    %10 = math.erf %9 : vector<16x128xf32>
    %cst_7 = arith.constant 1.000000e+00 : f32
    %11 = vector.broadcast %cst_7 : f32 to vector<16x128xf32>
    %12 = arith.addf %11, %10 : vector<16x128xf32>
    %13 = arith.mulf %7, %12 : vector<16x128xf32>
    %14 = arith.truncf %13 : vector<16x128xf32> to vector<16x128xbf16>
    %c0_8 = arith.constant 0 : index
    %c0_9 = arith.constant 0 : index
    %15 = vector.load %arg4[%c0_8, %c0_9] : memref<128x128xbf16, #tpu.memory_space<vmem>>, vector<128x128xbf16>
    %cst_10 = arith.constant dense<0.000000e+00> : vector<16x128xf32>
    %16 = tpu.matmul %14, %15, %cst_10 {dimension_numbers = #tpu.dot_dimension_numbers<[1], [0], [0], [1], [0, 0, 1, 1], [], []>} : vector<16x128xbf16>, vector<128x128xbf16>, vector<16x128xf32> -> vector<16x128xf32>
    %c0_11 = arith.constant 0 : index
    %c0_12 = arith.constant 0 : index
    %17 = vector.load %arg5[%c0_11, %c0_12] : memref<1x128xf32, #tpu.memory_space<vmem>>, vector<1x128xf32>
    %18 = vector.broadcast %17 : vector<1x128xf32> to vector<16x128xf32>
    %19 = arith.addf %16, %18 : vector<16x128xf32>
    %c0_13 = arith.constant 0 : index
    %c0_14 = arith.constant 0 : index
    %20 = vector.load %arg6[%c0_13, %c0_14] : memref<16x128xf32, #tpu.memory_space<vmem>>, vector<16x128xf32>
    tpu.vector_store %arg6[%c0_13, %c0_14], %19 {strides = array<i32>} : memref<16x128xf32, #tpu.memory_space<vmem>>, vector<16x128xf32>,
    return
  }
  func.func @transform_0(%arg0: i32) -> (i32, i32) {
    %c0_i32 = arith.constant 0 : i32
    %c0_i32_0 = arith.constant 0 : i32
    return %arg0, %c0_i32 : i32, i32
  }
  func.func @transform_1(%arg0: i32) -> (i32, i32) {
    %c0_i32 = arith.constant 0 : i32
    %c0_i32_0 = arith.constant 0 : i32
    %c0_i32_1 = arith.constant 0 : i32
    return %c0_i32, %c0_i32_0 : i32, i32
  }
  func.func @transform_2(%arg0: i32) -> (i32, i32) {
    %c0_i32 = arith.constant 0 : i32
    %c0_i32_0 = arith.constant 0 : i32
    %c0_i32_1 = arith.constant 0 : i32
    return %c0_i32, %c0_i32_0 : i32, i32
  }
  func.func @transform_3(%arg0: i32) -> (i32, i32) {
    %c0_i32 = arith.constant 0 : i32
    %c0_i32_0 = arith.constant 0 : i32
    %c0_i32_1 = arith.constant 0 : i32
    return %c0_i32, %c0_i32_0 : i32, i32
  }
  func.func @transform_4(%arg0: i32) -> (i32, i32) {
    %c0_i32 = arith.constant 0 : i32
    %c0_i32_0 = arith.constant 0 : i32
    %c0_i32_1 = arith.constant 0 : i32
    return %c0_i32, %c0_i32_0 : i32, i32
  }
  func.func @transform_5(%arg0: i32) -> (i32, i32) {
    %c0_i32 = arith.constant 0 : i32
    %c0_i32_0 = arith.constant 0 : i32
    return %arg0, %c0_i32 : i32, i32
  }
}

module attributes {stable_mosaic.version = 11 : i64} {
  func.func @_mlp_kernel_resident(%arg0: i32, %arg1: memref<16x128xbf16, #tpu.memory_space<vmem>>, %arg2: memref<128x128xbf16, #tpu.memory_space<vmem>>, %arg3: memref<1x128xf32, #tpu.memory_space<vmem>>, %arg4: memref<128x128xbf16, #tpu.memory_space<vmem>>, %arg5: memref<1x128xf32, #tpu.memory_space<vmem>>, %arg6: memref<16x128xf32, #tpu.memory_space<vmem>>) attributes {dimension_semantics = [#tpu.dimension_semantics<parallel>], iteration_bounds = array<i64: 1>, scalar_prefetch = 0 : i64, scratch_operands = 0 : i64, tpu.core_type = #tpu.core_type<tc>, window_params = [{transform_indices = @transform_0, window_bounds = array<i64: 16, 128>}, {pipeline_mode = #tpu.pipeline_mode<synchronous>, transform_indices = @transform_1, window_bounds = array<i64: 128, 128>}, {pipeline_mode = #tpu.pipeline_mode<synchronous>, transform_indices = @transform_2, window_bounds = array<i64: 1, 128>}, {pipeline_mode = #tpu.pipeline_mode<synchronous>, transform_indices = @transform_3, window_bounds = array<i64: 128, 128>}, {pipeline_mode = #tpu.pipeline_mode<synchronous>, transform_indices = @transform_4, window_bounds = array<i64: 1, 128>}, {transform_indices = @transform_5, window_bounds = array<i64: 16, 128>}]} {
    %c0 = arith.constant 0 : index
    %c0_0 = arith.constant 0 : index
    %0 = vector.load %arg1[%c0, %c0_0] : memref<16x128xbf16, #tpu.memory_space<vmem>>, vector<16x128xbf16>
    %c0_1 = arith.constant 0 : index
    %c0_2 = arith.constant 0 : index
    %1 = vector.load %arg2[%c0_1, %c0_2] : memref<128x128xbf16, #tpu.memory_space<vmem>>, vector<128x128xbf16>
    %cst = arith.constant dense<0.000000e+00> : vector<16x128xf32>
    %2 = tpu.matmul %0, %1, %cst {dimension_numbers = #tpu.dot_dimension_numbers<[1], [0], [0], [1], [0, 0, 1, 1], [], []>} : vector<16x128xbf16>, vector<128x128xbf16>, vector<16x128xf32> -> vector<16x128xf32>
    %c0_3 = arith.constant 0 : index
    %c0_4 = arith.constant 0 : index
    %3 = vector.load %arg3[%c0_3, %c0_4] : memref<1x128xf32, #tpu.memory_space<vmem>>, vector<1x128xf32>
    %4 = vector.broadcast %3 : vector<1x128xf32> to vector<16x128xf32>
    %5 = arith.addf %2, %4 : vector<16x128xf32>
    %cst_5 = arith.constant 5.000000e-01 : f32
    %6 = vector.broadcast %cst_5 : f32 to vector<16x128xf32>
    %7 = arith.mulf %6, %5 : vector<16x128xf32>
    %cst_6 = arith.constant 0.707106769 : f32
    %8 = vector.broadcast %cst_6 : f32 to vector<16x128xf32>
    %9 = arith.mulf %5, %8 : vector<16x128xf32>
    %10 = math.erf %9 : vector<16x128xf32>
    %cst_7 = arith.constant 1.000000e+00 : f32
    %11 = vector.broadcast %cst_7 : f32 to vector<16x128xf32>
    %12 = arith.addf %11, %10 : vector<16x128xf32>
    %13 = arith.mulf %7, %12 : vector<16x128xf32>
    %14 = arith.truncf %13 : vector<16x128xf32> to vector<16x128xbf16>
    %c0_8 = arith.constant 0 : index
    %c0_9 = arith.constant 0 : index
    %15 = vector.load %arg4[%c0_8, %c0_9] : memref<128x128xbf16, #tpu.memory_space<vmem>>, vector<128x128xbf16>
    %cst_10 = arith.constant dense<0.000000e+00> : vector<16x128xf32>
    %16 = tpu.matmul %14, %15, %cst_10 {dimension_numbers = #tpu.dot_dimension_numbers<[1], [0], [0], [1], [0, 0, 1, 1], [], []>} : vector<16x128xbf16>, vector<128x128xbf16>, vector<16x128xf32> -> vector<16x128xf32>
    %c0_11 = arith.constant 0 : index
    %c0_12 = arith.constant 0 : index
    %17 = vector.load %arg5[%c0_11, %c0_12] : memref<1x128xf32, #tpu.memory_space<vmem>>, vector<1x128xf32>
    %18 = vector.broadcast %17 : vector<1x128xf32> to vector<16x128xf32>
    %19 = arith.addf %16, %18 : vector<16x128xf32>
    %c0_13 = arith.constant 0 : index
    %c0_14 = arith.constant 0 : index
    %20 = vector.load %arg6[%c0_13, %c0_14] : memref<16x128xf32, #tpu.memory_space<vmem>>, vector<16x128xf32>
    tpu.vector_store %arg6[%c0_13, %c0_14], %19 {strides = array<i32>} : memref<16x128xf32, #tpu.memory_space<vmem>>, vector<16x128xf32>,
    return
  }
  func.func @transform_0(%arg0: i32) -> (i32, i32) {
    %c0_i32 = arith.constant 0 : i32
    %c0_i32_0 = arith.constant 0 : i32
    return %arg0, %c0_i32 : i32, i32
  }
  func.func @transform_1(%arg0: i32) -> (i32, i32) {
    %c0_i32 = arith.constant 0 : i32
    %c0_i32_0 = arith.constant 0 : i32
    %c0_i32_1 = arith.constant 0 : i32
    return %c0_i32, %c0_i32_0 : i32, i32
  }
  func.func @transform_2(%arg0: i32) -> (i32, i32) {
    %c0_i32 = arith.constant 0 : i32
    %c0_i32_0 = arith.constant 0 : i32
    %c0_i32_1 = arith.constant 0 : i32
    return %c0_i32, %c0_i32_0 : i32, i32
  }
  func.func @transform_3(%arg0: i32) -> (i32, i32) {
    %c0_i32 = arith.constant 0 : i32
    %c0_i32_0 = arith.constant 0 : i32
    %c0_i32_1 = arith.constant 0 : i32
    return %c0_i32, %c0_i32_0 : i32, i32
  }
  func.func @transform_4(%arg0: i32) -> (i32, i32) {
    %c0_i32 = arith.constant 0 : i32
    %c0_i32_0 = arith.constant 0 : i32
    %c0_i32_1 = arith.constant 0 : i32
    return %c0_i32, %c0_i32_0 : i32, i32
  }
  func.func @transform_5(%arg0: i32) -> (i32, i32) {
    %c0_i32 = arith.constant 0 : i32
    %c0_i32_0 = arith.constant 0 : i32
    return %arg0, %c0_i32 : i32, i32
  }
}

</mosaic_0001>

<bundles_post_ra>
// kernel: tpu_custom_call.1
= control target key start
LH: loop header
LB: loop body
LE: loop exit
PB: predicated region body
PF: predicated region fallthrough
CT: control target
= control target key end

     0   :  { %10 = vsyncpa [#allocation3], 0  ;;  %s628_s0 = inlined_call_operand.hbm [shape: bf16[16,128], index: 0, kind: input, shape index: {}]   ;;  %s629_s1 = inlined_call_operand.hbm [shape: bf16[128,128], index: 1, kind: input, shape index: {}]   ;;  %s630_s2 = inlined_call_operand.vmem [shape: f32[1,128], index: 2, kind: input, shape index: {}]   ;;  %s631_s3 = inlined_call_operand.hbm [shape: bf16[128,128], index: 3, kind: input, shape index: {}]   ;;  %s632_s4 = inlined_call_operand.vmem [shape: f32[1,128], index: 4, kind: input, shape index: {}]   ;;  %s633_s5 = inlined_call_operand.hbm [shape: f32[16,128], index: 5, kind: output, shape index: {}]  }
   0x1   :  { %11 = vsyncpa [#allocation6], 0 }
   0x2   :  { %12 = vsyncpa [#allocation4], 0  ;;  %s30_s20 = sshll.u32 %s629_s1, 4  ;;  %s554_s21 = smov [#allocation5]   ;;  %s31_s20 = int_to_ptr.hbm [resolvable:$true] %s30_s20 }
   0x3   :  { %s32_s22 = sshll.u32 %s554_s21, 4  ;;  %s17_s25 = sshll.u32 %s628_s0, 4  ;;  %s33_s22 = int_to_ptr.vmem [resolvable:$true] %s32_s22  ;;  %s18_s25 = int_to_ptr.hbm [resolvable:$true] %s17_s25 }
   0x4   :  { %s555_s26 = smov 64   ;;  %s556_s27 = smov 4  }
   0x5   :  { %38 = dma.hbm_to_vmem [thread:$0]  %s31_s20, 1024, %s33_s22, [#allocation6], %s555_s26, %s555_s26, %s556_s27  }
   0x6   :  { %s557_s28 = smov [#allocation2]   ;;  %s45_s7 = sshll.u32 %s631_s3, 4  ;;  %s46_s7 = int_to_ptr.hbm [resolvable:$true] %s45_s7 }
   0x7   :  { %s19_s29 = sshll.u32 %s557_s28, 4  ;;  %s558_s1 = smov [#allocation7]   ;;  %s20_s29 = int_to_ptr.vmem [resolvable:$true] %s19_s29 }
   0x8   :  { %25 = dma.hbm_to_vmem [thread:$0]  %s18_s25, 128, %s20_s29, [#allocation3], %s555_s26, %s555_s26, %s556_s27  }
   0x9   :  { %s47_s8 = sshll.u32 %s558_s1, 4  ;;  %s48_s8 = int_to_ptr.vmem [resolvable:$true] %s47_s8 }
   0xa   :  { %53 = dma.hbm_to_vmem [thread:$0]  %s46_s7, 1024, %s48_s8, [#allocation6], %s555_s26, %s555_s26, %s556_s27  }
   0xb   :  { %548 = dma.done.wait [#allocation3], 128  }
   0xc   :  { %549 = vsyncadd [#allocation3], 4294967168 }
   0xd   :  { %550 = dma.done.wait [#allocation6], 2048  }
   0xe   :  { %551 = vsyncadd [#allocation6], 4294965248  ;;  %v429_v0 = vld [vmem:[#allocation5 + $0x38] sm:$0xff]  ;;  %v428_v1 = vld [vmem:[#allocation5 + $0x30] sm:$0xff]  ;;  %s559_s10 = smov [#allocation8]   ;;  %s337_s14 = sshll.u32 %s633_s5, 4  ;;  %s338_s14 = int_to_ptr.hbm [resolvable:$true] %s337_s14 }
   0xf   :  { %144 = vmatpush.bf16.msra.mxu0 %v429_v0  ;;  %v427_v2 = vld [vmem:[#allocation5 + $0x28] sm:$0xff]  ;;  %v426_v3 = vld [vmem:[#allocation5 + $0x20] sm:$0xff]  ;;  %v425_v4 = vld [vmem:[#allocation5 + $0x18] sm:$0xff]  ;;  %s335_s11 = sshll.u32 %s559_s10, 4  ;;  %s560_s15 = smov 128   ;;  %s336_s11 = int_to_ptr.vmem [resolvable:$true] %s335_s11 }
  0x10   :  { %v424_v5 = vld [vmem:[#allocation5 + $0x10] sm:$0xff]  ;;  %v423_v6 = vld [vmem:[#allocation5 + $0x8] sm:$0xff]  ;;  %v422_v7 = vld [vmem:[#allocation5] sm:$0xff]  ;;  %s561_s16 = smov 8  }
  0x11   :  { %v421_v8 = vld [vmem:[#allocation2] sm:$0xff]  ;;  %v436_v14 = vld [vmem:[#allocation7 + $0x30] sm:$0xff]  ;;  %v435_v16 = vld [vmem:[#allocation7 + $0x28] sm:$0xff] }
  0x12   :  { %v446_v9 = vld [vmem:[%s630_s2] ss:$0 sm:$0xff]  ;;  %v434_v21 = vld [vmem:[#allocation7 + $0x20] sm:$0xff]  ;;  %v432_v33 = vld [vmem:[#allocation7 + $0x10] sm:$0xff] }
  0x13   :  { %145 = vmatpush.bf16.msra.mxu0 %v428_v1  ;;  %v437_v10 = vld [vmem:[#allocation7 + $0x38] sm:$0xff]  ;;  %v431_v41 = vld [vmem:[#allocation7 + $0x8] sm:$0xff]  ;;  %v430_v48 = vld [vmem:[#allocation7] sm:$0xff] }
  0x14   :  { %315 = vmatpush.bf16.msra.mxu1 %v437_v10  ;;  %v433_v27 = vld [vmem:[#allocation7 + $0x18] sm:$0xff] }
  0x17   :  { %146 = vmatpush.bf16.msra.mxu0 %v427_v2 }
  0x18   :  { %316 = vmatpush.bf16.msra.mxu1 %v436_v14 }
  0x1b   :  { %147 = vmatpush.bf16.msra.mxu0 %v426_v3 }
  0x1c   :  { %317 = vmatpush.bf16.msra.mxu1 %v435_v16 }
  0x1f   :  { %148 = vmatpush.bf16.msra.mxu0 %v425_v4 }
  0x20   :  { %318 = vmatpush.bf16.msra.mxu1 %v434_v21 }
  0x23   :  { %149 = vmatpush.bf16.msra.mxu0 %v424_v5 }
  0x24   :  { %319 = vmatpush.bf16.msra.mxu1 %v433_v27 }
  0x27   :  { %150 = vmatpush.bf16.msra.mxu0 %v423_v6 }
  0x28   :  { %320 = vmatpush.bf16.msra.mxu1 %v432_v33 }
  0x2b   :  { %151 = vmatpush.bf16.msra.mxu0 %v422_v7 }
  0x2c   :  { %321 = vmatpush.bf16.msra.mxu1 %v431_v41 }
  0x2e   :  { %152 = vmatmul.bf16.vlgmr.msra.gmra.mxu0 %v421_v8 }
  0x30   :  { %322 = vmatpush.bf16.msra.mxu1 %v430_v48 }
  0xab   :  { %v153_v11 = vpop.f32.mrf.mxu0 }
  0xac   :  { %v604_v12 = vadd.f32 %v446_v9, %v153_v11 }
  0xae   :  { %v607_v13 = vmul.f32 0.70710677, %v604_v12 }
  0xb0   :  { %v162_v15 = vmul.f32 %v607_v13, %v607_v13 }
  0xb2   :  { %v163_v17 = vmin.f32 %v162_v15, 16.0 }
  0xb3   :  { %v155_v18 = vpop.f32.mrf.mxu0 }
  0xb4   :  { %v164_v19 = vmul.f32 2.1237322e-06, %v163_v17  ;;  %v611_v20 = vadd.f32 %v446_v9, %v155_v18  ;;  %v175_v22 = vmul.f32 3.8918573e-05, %v163_v17 }
  0xb6   :  { %v165_v23 = vadd.f32 0.00028619796, %v164_v19  ;;  %v614_v24 = vmul.f32 0.70710677, %v611_v20  ;;  %v176_v25 = vadd.f32 0.001143296, %v175_v22 }
  0xb8   :  { %v202_v26 = vmul.f32 %v614_v24, %v614_v24  ;;  %v166_v28 = vmul.f32 %v165_v23, %v163_v17  ;;  %v177_v29 = vmul.f32 %v176_v25, %v163_v17 }
  0xba   :  { %v203_v30 = vmin.f32 %v202_v26, 16.0  ;;  %v178_v31 = vadd.f32 0.014752088, %v177_v29  ;;  %v167_v35 = vadd.f32 0.0036580483, %v166_v28 }
  0xbc   :  { %v204_v32 = vmul.f32 2.1237322e-06, %v203_v30  ;;  %v215_v34 = vmul.f32 3.8918573e-05, %v203_v30  ;;  %v179_v36 = vmul.f32 %v178_v31, %v163_v17  ;;  %v168_v43 = vmul.f32 %v167_v35, %v163_v17 }
  0xbd   :  { %v159_v35 = vmul.f32 0.5, %v611_v20 }
  0xbe   :  { %v205_v37 = vadd.f32 0.00028619796, %v204_v32  ;;  %v216_v38 = vadd.f32 0.001143296, %v215_v34  ;;  %v180_v39 = vadd.f32 0.112945676, %v179_v36 }
  0xbf   :  { %v169_v50 = vadd.f32 0.05243302, %v168_v43  ;;  %v158_v34 = vmul.f32 0.5, %v604_v12 }
  0xc0   :  { %v206_v40 = vmul.f32 %v205_v37, %v203_v30  ;;  %v217_v42 = vmul.f32 %v216_v38, %v203_v30  ;;  %v181_v44 = vmul.f32 %v180_v39, %v163_v17 }
  0xc1   :  { %v170_v56 = vmul.f32 %v169_v50, %v163_v17 }
  0xc2   :  { %v207_v45 = vadd.f32 0.0036580483, %v206_v40  ;;  %v218_v46 = vadd.f32 0.014752088, %v217_v42  ;;  %v182_v47 = vadd.f32 0.4994258, %v181_v44 }
  0xc3   :  { %v171_v60 = vadd.f32 0.18741608, %v170_v56 }
  0xc4   :  { %v219_v49 = vmul.f32 %v218_v46, %v203_v30  ;;  %v183_v51 = vmul.f32 %v182_v47, %v163_v17  ;;  %v208_v52 = vmul.f32 %v207_v45, %v203_v30 }
  0xc5   :  { %v172_v1 = vmul.f32 %v171_v60, %v163_v17 }
  0xc6   :  { %v220_v53 = vadd.f32 0.112945676, %v219_v49  ;;  %v184_v54 = vadd.f32 1.0, %v183_v51  ;;  %v209_v57 = vadd.f32 0.05243302, %v208_v52 }
  0xc7   :  { %v173_v7 = vadd.f32 1.1283791, %v172_v1 }
  0xc8   :  { %v221_v55 = vmul.f32 %v220_v53, %v203_v30  ;;  %448 = vrcp.f32 %v184_v54  ;;  %v210_v61 = vmul.f32 %v209_v57, %v203_v30  ;;  %v196_v4 = vand.u32 2147483648, %v184_v54 }
  0xc9   :  { %v194_v6 = vand.u32 2147483647, %v184_v54  ;;  %vm190_vm1 = vweird.f32 %v184_v54  ;;  %v174_v16 = vmul.f32 %v173_v7, %v607_v13 }
  0xca   :  { %v222_v58 = vadd.f32 0.4994258, %v221_v55  ;;  %v211_v2 = vadd.f32 0.18741608, %v210_v61  ;;  %v197_v11 = vor.u32 1.1754944e-38, %v196_v4 }
  0xcb   :  { %vm195_vm3 = vcmp.eq.f32.partialorder %v194_v6, 8.507059e+37 }
  0xcc   :  { %v223_v59 = vmul.f32 %v222_v58, %v203_v30  ;;  %v212_v9 = vmul.f32 %v211_v2, %v203_v30 }
  0xce   :  { %v224_v62 = vadd.f32 1.0, %v223_v59  ;;  %v449_v63 = vpop.eup %448  ;;  %v213_v19 = vadd.f32 1.1283791, %v212_v9 }
  0xcf   :  { %v186_v0 = vmul.f32 %v449_v63, %v184_v54  ;;  %vm191_vm0 = vweird.f32 %v449_v63 }
  0xd0   :  { %450 = vrcp.f32 %v224_v62  ;;  %vm192_vm2 = vmor %vm190_vm1, %vm191_vm0  ;;  %v236_v21 = vand.u32 2147483648, %v224_v62  ;;  %v234_v25 = vand.u32 2147483647, %v224_v62  ;;  %vm230_vm5 = vweird.f32 %v224_v62 }
  0xd1   :  { %v187_v3 = vsub.f32 1.0, %v186_v0  ;;  %v214_v28 = vmul.f32 %v213_v19, %v614_v24  ;;  %v447_v24 = vld [vmem:[%s632_s4] ss:$0 sm:$0xff] }
  0xd2   :  { %v237_v27 = vor.u32 1.1754944e-38, %v236_v21  ;;  %vm235_vm7 = vcmp.eq.f32.partialorder %v234_v25, 8.507059e+37 }
  0xd3   :  { %v188_v5 = vmul.f32 %v449_v63, %v187_v3 }
  0xd5   :  { %v189_v10 = vadd.f32 %v449_v63, %v188_v5 }
  0xd6   :  { %v451_v8 = vpop.eup %450 }
  0xd7   :  { %v226_v14 = vmul.f32 %v451_v8, %v224_v62  ;;  %v193_v15 = vsel %vm192_vm2, %v449_v63, %v189_v10  ;;  %vm231_vm4 = vweird.f32 %v451_v8 }
  0xd8   :  { %v198_v18 = vsel %vm195_vm3, %v197_v11, %v193_v15  ;;  %vm232_vm6 = vmor %vm230_vm5, %vm231_vm4 }
  0xd9   :  { %v227_v17 = vsub.f32 1.0, %v226_v14  ;;  %v199_v22 = vmul.f32 %v198_v18, %v174_v16 }
  0xdb   :  { %v228_v23 = vmul.f32 %v451_v8, %v227_v17  ;;  %v387_v29 = vclamps-f32 %v199_v22, 1.0 }
  0xdd   :  { %v229_v26 = vadd.f32 %v451_v8, %v228_v23  ;;  %v242_v33 = vadd.f32 1.0, %v387_v29 }
  0xdf   :  { %v233_v30 = vsel %vm232_vm6, %v451_v8, %v229_v26  ;;  %v244_v37 = vmul.f32 %v242_v33, %v158_v34 }
  0xe0   :  { %v238_v31 = vsel %vm235_vm7, %v237_v27, %v233_v30 }
  0xe1   :  { %v239_v32 = vmul.f32 %v238_v31, %v214_v28 }
  0xe3   :  { %v388_v13 = vclamps-f32 %v239_v32, 1.0 }
  0xe5   :  { %v243_v36 = vadd.f32 1.0, %v388_v13 }
  0xe7   :  { %v245_v38 = vmul.f32 %v243_v36, %v159_v35 }
  0xe9   :  { %v246_v39 = vpack.c.bf16 %v245_v38, %v244_v37 }
  0xeb   :  { %323 = vmatmul.bf16.vlgmr.msra.gmra.mxu1 %v246_v39 }
 0x168   :  { %v324_v40 = vpop.f32.mrf.mxu1 }
 0x169   :  { %v325_v41 = vadd.f32 %v447_v24, %v324_v40 }
 0x16b   :  { %329 = vst [vmem:[#allocation8] sm:$0xff] %v325_v41 }
 0x170   :  { %v326_v12 = vpop.f32.mrf.mxu1 }
 0x171   :  { %v327_v20 = vadd.f32 %v447_v24, %v326_v12 }
 0x173   :  { %330 = vst [vmem:[#allocation8 + $0x8] sm:$0xff] %v327_v20 }
 0x174   :  { %343 = dma.vmem_to_hbm [thread:$0]  %s336_s11, 256, %s338_s14, [#allocation4], %s560_s15, %s560_s15, %s561_s16  }
 0x175   :  { %552 = dma.done.wait [#allocation4], 256  }
 0x176   :  { %553 = vsyncadd [#allocation4], 4294967040 }
 0x177   :  { %348 = vsyncpa [#allocation3], 1 }
 0x178   :  { %349 = vsyncpa [#allocation6], 1 }
 0x179   :  { %350 = vsyncpa [#allocation4], 1 }

// kernel: tpu_custom_call.1
= control target key start
LH: loop header
LB: loop body
LE: loop exit
PB: predicated region body
PF: predicated region fallthrough
CT: control target
= control target key end

     0   :  { %10 = vsyncpa [#allocation3], 0  ;;  %s628_s0 = inlined_call_operand.hbm [shape: bf16[16,128], index: 0, kind: input, shape index: {}]   ;;  %s629_s1 = inlined_call_operand.hbm [shape: bf16[128,128], index: 1, kind: input, shape index: {}]   ;;  %s630_s2 = inlined_call_operand.vmem [shape: f32[1,128], index: 2, kind: input, shape index: {}]   ;;  %s631_s3 = inlined_call_operand.hbm [shape: bf16[128,128], index: 3, kind: input, shape index: {}]   ;;  %s632_s4 = inlined_call_operand.vmem [shape: f32[1,128], index: 4, kind: input, shape index: {}]   ;;  %s633_s5 = inlined_call_operand.hbm [shape: f32[16,128], index: 5, kind: output, shape index: {}]  }
   0x1   :  { %11 = vsyncpa [#allocation6], 0 }
   0x2   :  { %12 = vsyncpa [#allocation4], 0  ;;  %s30_s20 = sshll.u32 %s629_s1, 4  ;;  %s554_s21 = smov [#allocation5]   ;;  %s31_s20 = int_to_ptr.hbm [resolvable:$true] %s30_s20 }
   0x3   :  { %s32_s22 = sshll.u32 %s554_s21, 4  ;;  %s17_s25 = sshll.u32 %s628_s0, 4  ;;  %s33_s22 = int_to_ptr.vmem [resolvable:$true] %s32_s22  ;;  %s18_s25 = int_to_ptr.hbm [resolvable:$true] %s17_s25 }
   0x4   :  { %s555_s26 = smov 64   ;;  %s556_s27 = smov 4  }
   0x5   :  { %38 = dma.hbm_to_vmem [thread:$0]  %s31_s20, 1024, %s33_s22, [#allocation6], %s555_s26, %s555_s26, %s556_s27  }
   0x6   :  { %s557_s28 = smov [#allocation2]   ;;  %s45_s7 = sshll.u32 %s631_s3, 4  ;;  %s46_s7 = int_to_ptr.hbm [resolvable:$true] %s45_s7 }
   0x7   :  { %s19_s29 = sshll.u32 %s557_s28, 4  ;;  %s558_s1 = smov [#allocation7]   ;;  %s20_s29 = int_to_ptr.vmem [resolvable:$true] %s19_s29 }
   0x8   :  { %25 = dma.hbm_to_vmem [thread:$0]  %s18_s25, 128, %s20_s29, [#allocation3], %s555_s26, %s555_s26, %s556_s27  }
   0x9   :  { %s47_s8 = sshll.u32 %s558_s1, 4  ;;  %s48_s8 = int_to_ptr.vmem [resolvable:$true] %s47_s8 }
   0xa   :  { %53 = dma.hbm_to_vmem [thread:$0]  %s46_s7, 1024, %s48_s8, [#allocation6], %s555_s26, %s555_s26, %s556_s27  }
   0xb   :  { %548 = dma.done.wait [#allocation3], 128  }
   0xc   :  { %549 = vsyncadd [#allocation3], 4294967168 }
   0xd   :  { %550 = dma.done.wait [#allocation6], 2048  }
   0xe   :  { %551 = vsyncadd [#allocation6], 4294965248  ;;  %v429_v0 = vld [vmem:[#allocation5 + $0x38] sm:$0xff]  ;;  %v428_v1 = vld [vmem:[#allocation5 + $0x30] sm:$0xff]  ;;  %s559_s10 = smov [#allocation8]   ;;  %s337_s14 = sshll.u32 %s633_s5, 4  ;;  %s338_s14 = int_to_ptr.hbm [resolvable:$true] %s337_s14 }
   0xf   :  { %144 = vmatpush.bf16.msra.mxu0 %v429_v0  ;;  %v427_v2 = vld [vmem:[#allocation5 + $0x28] sm:$0xff]  ;;  %v426_v3 = vld [vmem:[#allocation5 + $0x20] sm:$0xff]  ;;  %v425_v4 = vld [vmem:[#allocation5 + $0x18] sm:$0xff]  ;;  %s335_s11 = sshll.u32 %s559_s10, 4  ;;  %s560_s15 = smov 128   ;;  %s336_s11 = int_to_ptr.vmem [resolvable:$true] %s335_s11 }
  0x10   :  { %v424_v5 = vld [vmem:[#allocation5 + $0x10] sm:$0xff]  ;;  %v423_v6 = vld [vmem:[#allocation5 + $0x8] sm:$0xff]  ;;  %v422_v7 = vld [vmem:[#allocation5] sm:$0xff]  ;;  %s561_s16 = smov 8  }
  0x11   :  { %v421_v8 = vld [vmem:[#allocation2] sm:$0xff]  ;;  %v436_v14 = vld [vmem:[#allocation7 + $0x30] sm:$0xff]  ;;  %v435_v16 = vld [vmem:[#allocation7 + $0x28] sm:$0xff] }
  0x12   :  { %v446_v9 = vld [vmem:[%s630_s2] ss:$0 sm:$0xff]  ;;  %v434_v21 = vld [vmem:[#allocation7 + $0x20] sm:$0xff]  ;;  %v432_v33 = vld [vmem:[#allocation7 + $0x10] sm:$0xff] }
  0x13   :  { %145 = vmatpush.bf16.msra.mxu0 %v428_v1  ;;  %v437_v10 = vld [vmem:[#allocation7 + $0x38] sm:$0xff]  ;;  %v431_v41 = vld [vmem:[#allocation7 + $0x8] sm:$0xff]  ;;  %v430_v48 = vld [vmem:[#allocation7] sm:$0xff] }
  0x14   :  { %315 = vmatpush.bf16.msra.mxu1 %v437_v10  ;;  %v433_v27 = vld [vmem:[#allocation7 + $0x18] sm:$0xff] }
  0x17   :  { %146 = vmatpush.bf16.msra.mxu0 %v427_v2 }
  0x18   :  { %316 = vmatpush.bf16.msra.mxu1 %v436_v14 }
  0x1b   :  { %147 = vmatpush.bf16.msra.mxu0 %v426_v3 }
  0x1c   :  { %317 = vmatpush.bf16.msra.mxu1 %v435_v16 }
  0x1f   :  { %148 = vmatpush.bf16.msra.mxu0 %v425_v4 }
  0x20   :  { %318 = vmatpush.bf16.msra.mxu1 %v434_v21 }
  0x23   :  { %149 = vmatpush.bf16.msra.mxu0 %v424_v5 }
  0x24   :  { %319 = vmatpush.bf16.msra.mxu1 %v433_v27 }
  0x27   :  { %150 = vmatpush.bf16.msra.mxu0 %v423_v6 }
  0x28   :  { %320 = vmatpush.bf16.msra.mxu1 %v432_v33 }
  0x2b   :  { %151 = vmatpush.bf16.msra.mxu0 %v422_v7 }
  0x2c   :  { %321 = vmatpush.bf16.msra.mxu1 %v431_v41 }
  0x2e   :  { %152 = vmatmul.bf16.vlgmr.msra.gmra.mxu0 %v421_v8 }
  0x30   :  { %322 = vmatpush.bf16.msra.mxu1 %v430_v48 }
  0xab   :  { %v153_v11 = vpop.f32.mrf.mxu0 }
  0xac   :  { %v604_v12 = vadd.f32 %v446_v9, %v153_v11 }
  0xae   :  { %v607_v13 = vmul.f32 0.70710677, %v604_v12 }
  0xb0   :  { %v162_v15 = vmul.f32 %v607_v13, %v607_v13 }
  0xb2   :  { %v163_v17 = vmin.f32 %v162_v15, 16.0 }
  0xb3   :  { %v155_v18 = vpop.f32.mrf.mxu0 }
  0xb4   :  { %v164_v19 = vmul.f32 2.1237322e-06, %v163_v17  ;;  %v611_v20 = vadd.f32 %v446_v9, %v155_v18  ;;  %v175_v22 = vmul.f32 3.8918573e-05, %v163_v17 }
  0xb6   :  { %v165_v23 = vadd.f32 0.00028619796, %v164_v19  ;;  %v614_v24 = vmul.f32 0.70710677, %v611_v20  ;;  %v176_v25 = vadd.f32 0.001143296, %v175_v22 }
  0xb8   :  { %v202_v26 = vmul.f32 %v614_v24, %v614_v24  ;;  %v166_v28 = vmul.f32 %v165_v23, %v163_v17  ;;  %v177_v29 = vmul.f32 %v176_v25, %v163_v17 }
  0xba   :  { %v203_v30 = vmin.f32 %v202_v26, 16.0  ;;  %v178_v31 = vadd.f32 0.014752088, %v177_v29  ;;  %v167_v35 = vadd.f32 0.0036580483, %v166_v28 }
  0xbc   :  { %v204_v32 = vmul.f32 2.1237322e-06, %v203_v30  ;;  %v215_v34 = vmul.f32 3.8918573e-05, %v203_v30  ;;  %v179_v36 = vmul.f32 %v178_v31, %v163_v17  ;;  %v168_v43 = vmul.f32 %v167_v35, %v163_v17 }
  0xbd   :  { %v159_v35 = vmul.f32 0.5, %v611_v20 }
  0xbe   :  { %v205_v37 = vadd.f32 0.00028619796, %v204_v32  ;;  %v216_v38 = vadd.f32 0.001143296, %v215_v34  ;;  %v180_v39 = vadd.f32 0.112945676, %v179_v36 }
  0xbf   :  { %v169_v50 = vadd.f32 0.05243302, %v168_v43  ;;  %v158_v34 = vmul.f32 0.5, %v604_v12 }
  0xc0   :  { %v206_v40 = vmul.f32 %v205_v37, %v203_v30  ;;  %v217_v42 = vmul.f32 %v216_v38, %v203_v30  ;;  %v181_v44 = vmul.f32 %v180_v39, %v163_v17 }
  0xc1   :  { %v170_v56 = vmul.f32 %v169_v50, %v163_v17 }
  0xc2   :  { %v207_v45 = vadd.f32 0.0036580483, %v206_v40  ;;  %v218_v46 = vadd.f32 0.014752088, %v217_v42  ;;  %v182_v47 = vadd.f32 0.4994258, %v181_v44 }
  0xc3   :  { %v171_v60 = vadd.f32 0.18741608, %v170_v56 }
  0xc4   :  { %v219_v49 = vmul.f32 %v218_v46, %v203_v30  ;;  %v183_v51 = vmul.f32 %v182_v47, %v163_v17  ;;  %v208_v52 = vmul.f32 %v207_v45, %v203_v30 }
  0xc5   :  { %v172_v1 = vmul.f32 %v171_v60, %v163_v17 }
  0xc6   :  { %v220_v53 = vadd.f32 0.112945676, %v219_v49  ;;  %v184_v54 = vadd.f32 1.0, %v183_v51  ;;  %v209_v57 = vadd.f32 0.05243302, %v208_v52 }
  0xc7   :  { %v173_v7 = vadd.f32 1.1283791, %v172_v1 }
  0xc8   :  { %v221_v55 = vmul.f32 %v220_v53, %v203_v30  ;;  %448 = vrcp.f32 %v184_v54  ;;  %v210_v61 = vmul.f32 %v209_v57, %v203_v30  ;;  %v196_v4 = vand.u32 2147483648, %v184_v54 }
  0xc9   :  { %v194_v6 = vand.u32 2147483647, %v184_v54  ;;  %vm190_vm1 = vweird.f32 %v184_v54  ;;  %v174_v16 = vmul.f32 %v173_v7, %v607_v13 }
  0xca   :  { %v222_v58 = vadd.f32 0.4994258, %v221_v55  ;;  %v211_v2 = vadd.f32 0.18741608, %v210_v61  ;;  %v197_v11 = vor.u32 1.1754944e-38, %v196_v4 }
  0xcb   :  { %vm195_vm3 = vcmp.eq.f32.partialorder %v194_v6, 8.507059e+37 }
  0xcc   :  { %v223_v59 = vmul.f32 %v222_v58, %v203_v30  ;;  %v212_v9 = vmul.f32 %v211_v2, %v203_v30 }
  0xce   :  { %v224_v62 = vadd.f32 1.0, %v223_v59  ;;  %v449_v63 = vpop.eup %448  ;;  %v213_v19 = vadd.f32 1.1283791, %v212_v9 }
  0xcf   :  { %v186_v0 = vmul.f32 %v449_v63, %v184_v54  ;;  %vm191_vm0 = vweird.f32 %v449_v63 }
  0xd0   :  { %450 = vrcp.f32 %v224_v62  ;;  %vm192_vm2 = vmor %vm190_vm1, %vm191_vm0  ;;  %v236_v21 = vand.u32 2147483648, %v224_v62  ;;  %v234_v25 = vand.u32 2147483647, %v224_v62  ;;  %vm230_vm5 = vweird.f32 %v224_v62 }
  0xd1   :  { %v187_v3 = vsub.f32 1.0, %v186_v0  ;;  %v214_v28 = vmul.f32 %v213_v19, %v614_v24  ;;  %v447_v24 = vld [vmem:[%s632_s4] ss:$0 sm:$0xff] }
  0xd2   :  { %v237_v27 = vor.u32 1.1754944e-38, %v236_v21  ;;  %vm235_vm7 = vcmp.eq.f32.partialorder %v234_v25, 8.507059e+37 }
  0xd3   :  { %v188_v5 = vmul.f32 %v449_v63, %v187_v3 }
  0xd5   :  { %v189_v10 = vadd.f32 %v449_v63, %v188_v5 }
  0xd6   :  { %v451_v8 = vpop.eup %450 }
  0xd7   :  { %v226_v14 = vmul.f32 %v451_v8, %v224_v62  ;;  %v193_v15 = vsel %vm192_vm2, %v449_v63, %v189_v10  ;;  %vm231_vm4 = vweird.f32 %v451_v8 }
  0xd8   :  { %v198_v18 = vsel %vm195_vm3, %v197_v11, %v193_v15  ;;  %vm232_vm6 = vmor %vm230_vm5, %vm231_vm4 }
  0xd9   :  { %v227_v17 = vsub.f32 1.0, %v226_v14  ;;  %v199_v22 = vmul.f32 %v198_v18, %v174_v16 }
  0xdb   :  { %v228_v23 = vmul.f32 %v451_v8, %v227_v17  ;;  %v387_v29 = vclamps-f32 %v199_v22, 1.0 }
  0xdd   :  { %v229_v26 = vadd.f32 %v451_v8, %v228_v23  ;;  %v242_v33 = vadd.f32 1.0, %v387_v29 }
  0xdf   :  { %v233_v30 = vsel %vm232_vm6, %v451_v8, %v229_v26  ;;  %v244_v37 = vmul.f32 %v242_v33, %v158_v34 }
  0xe0   :  { %v238_v31 = vsel %vm235_vm7, %v237_v27, %v233_v30 }
  0xe1   :  { %v239_v32 = vmul.f32 %v238_v31, %v214_v28 }
  0xe3   :  { %v388_v13 = vclamps-f32 %v239_v32, 1.0 }
  0xe5   :  { %v243_v36 = vadd.f32 1.0, %v388_v13 }
  0xe7   :  { %v245_v38 = vmul.f32 %v243_v36, %v159_v35 }
  0xe9   :  { %v246_v39 = vpack.c.bf16 %v245_v38, %v244_v37 }
  0xeb   :  { %323 = vmatmul.bf16.vlgmr.msra.gmra.mxu1 %v246_v39 }
 0x168   :  { %v324_v40 = vpop.f32.mrf.mxu1 }
 0x169   :  { %v325_v41 = vadd.f32 %v447_v24, %v324_v40 }
 0x16b   :  { %329 = vst [vmem:[#allocation8] sm:$0xff] %v325_v41 }
 0x170   :  { %v326_v12 = vpop.f32.mrf.mxu1 }
 0x171   :  { %v327_v20 = vadd.f32 %v447_v24, %v326_v12 }
 0x173   :  { %330 = vst [vmem:[#allocation8 + $0x8] sm:$0xff] %v327_v20 }
 0x174   :  { %343 = dma.vmem_to_hbm [thread:$0]  %s336_s11, 256, %s338_s14, [#allocation4], %s560_s15, %s560_s15, %s561_s16  }
 0x175   :  { %552 = dma.done.wait [#allocation4], 256  }
 0x176   :  { %553 = vsyncadd [#allocation4], 4294967040 }
 0x177   :  { %348 = vsyncpa [#allocation3], 1 }
 0x178   :  { %349 = vsyncpa [#allocation6], 1 }
 0x179   :  { %350 = vsyncpa [#allocation4], 1 }

</bundles_post_ra>
